<compile_context>
chip_gen: v7x
topology: tpu7x:2x2x1
jax: 0.10.0
libtpu: 0.0.40
codegen_flags: <defaults>
</compile_context>

<pallas_src>
import numpy as np
import jax
import jax.numpy as jnp
from jax.experimental import pallas as pl
from jax.experimental.pallas import tpu as pltpu

BOARD_C, BOARD_H, BOARD_W = 12, 8, 8
N_POS = BOARD_H * BOARD_W                  # 64
BOARD_FEATS = BOARD_C * N_POS              # 768
EXTRA_FEATS = 12
IN_FEATS = BOARD_FEATS + EXTRA_FEATS       # 780
N_OUT = 3
OUT_LANES = 128                            # lane-dense output slab; logits live in [:, :N_OUT]
MIN_SPLIT_ROWS = 256                       # batches >= 2*this are split into >= 2 grid steps


def _chip_budget():
    """Pick (max batch tile, scoped-VMEM limit) from the chip's per-core VMEM size."""
    try:
        vmem_bytes = int(pltpu.get_tpu_info().vmem_capacity_bytes)
    except Exception:                       # detection unavailable -> be conservative (v7x-sized)
        vmem_bytes = 64 * 1024 * 1024
    if vmem_bytes >= 96 * 1024 * 1024:      # v5e / v6e: 128 MiB VMEM
        return 4096, 80 * 1024 * 1024
    return 2048, 40 * 1024 * 1024           # v7x: 64 MiB per TensorCore


MAX_BATCH_TILE, VMEM_LIMIT_BYTES = _chip_budget()


def _round_up(a, m):
    return ((a + m - 1) // m) * m


def _build_tap_matrix():
    """S[k, p_in, p_out] = 1 iff input position p_in is the (dy,dx) tap of output p_out.

    k = (dy+1)*3 + (dx+1) matches PyTorch's (ky, kx) kernel index after a row-major
    reshape of the 3x3 kernel.  Built once with numpy (constant, 147 KiB).
    """
    s = np.zeros((9, N_POS, N_POS), np.float32)
    for dy in (-1, 0, 1):
        for dx in (-1, 0, 1):
            k = (dy + 1) * 3 + (dx + 1)
            for y in range(BOARD_H):
                for x in range(BOARD_W):
                    yy, xx = y + dy, x + dx
                    if 0 <= yy < BOARD_H and 0 <= xx < BOARD_W:
                        s[k, yy * BOARD_W + xx, y * BOARD_W + x] = 1.0
    return s


_TAP_MATRIX = _build_tap_matrix()


def _conv_as_matmul(w):
    """(Cout, Cin, 3, 3) OIHW conv weight -> (Cin*64, Cout*64) dense matrix (f32).

    Row = ci*64 + input position, Col = co*64 + output position (both NCHW-flat),
    so a padded 3x3 conv over the 8x8 board becomes ONE MXU matmul.
    """
    cout, cin = w.shape[0], w.shape[1]
    wk = w.astype(jnp.float32).reshape(cout, cin, 9)
    m = jnp.einsum("ock,kpq->cpoq", wk, _TAP_MATRIX)       # (cin, 64, cout, 64)
    return m.reshape(cin * N_POS, cout * N_POS)


def prepare_params(params):
    """One-time weight prep (hoisted out of the hot path): fold convs into matrices,
    transpose/ pad FC weights, build f32 bias rows.  Returns a dict of device arrays."""
    c1w, c1b, c2w, c2b, fc1w, fc1b, ow, ob = params
    f32, bf16 = jnp.float32, jnp.bfloat16

    m1 = _conv_as_matmul(c1w).astype(bf16)                            # (768, 256)
    m2 = _conv_as_matmul(c2w).astype(bf16)                            # (256, 512)
    b1 = jnp.repeat(c1b.astype(f32), N_POS).reshape(1, -1)            # (1, 256)
    b2 = jnp.repeat(c2b.astype(f32), N_POS).reshape(1, -1)            # (1, 512)

    conv_feat = N_POS * c2w.shape[0]                                  # 512
    w1t = fc1w.astype(f32).T                                          # (524, 64)
    w1b = w1t[:conv_feat].astype(bf16)                                # (512, 64) NCHW rows, no permutation
    # extras rows folded onto raw x: zero rows for the 768 board lanes, fc1 rows at 768..779
    w1x = (jnp.zeros((IN_FEATS, w1t.shape[1]), f32)
           .at[BOARD_FEATS:, :].set(w1t[conv_feat:])).astype(bf16)    # (780, 64)
    fb1 = fc1b.astype(f32).reshape(1, -1)                             # (1, 64)

    ow_t = ow.astype(f32).T                                           # (64, 3)
    w2 = (jnp.zeros((ow_t.shape[0], OUT_LANES), f32)
          .at[:, :ow_t.shape[1]].set(ow_t)).astype(bf16)              # (64, 128) lane-dense head
    obp = jnp.zeros((1, OUT_LANES), f32).at[0, :ob.shape[0]].set(ob.astype(f32))

    return {"m1": m1, "b1": b1, "m2": m2, "b2": b2,
            "w1b": w1b, "w1x": w1x, "fb1": fb1, "w2": w2, "ob": obp}


def _cnn_kernel(x_ref, m1_ref, b1_ref, m2_ref, b2_ref,
                w1b_ref, w1x_ref, fb1_ref, w2_ref, ob_ref, out_ref):
    f32, bf16 = jnp.float32, jnp.bfloat16
    x = x_ref[...]                                            # (TB, 780) bf16
    board = x[:, :BOARD_FEATS]                                # (TB, 768) lane-aligned slice

    # conv1 as one bf16 MXU matmul; bias + ReLU in f32
    h1 = jnp.dot(board, m1_ref[...], preferred_element_type=f32) + b1_ref[...]
    h1 = jnp.maximum(h1, 0.0).astype(bf16)                    # (TB, 256)

    # conv2
    h2 = jnp.dot(h1, m2_ref[...], preferred_element_type=f32) + b2_ref[...]
    h2 = jnp.maximum(h2, 0.0).astype(bf16)                    # (TB, 512) NCHW-flat lanes

    # FC1: conv part + extras folded onto raw x (w1x is zero on the board lanes)
    z = jnp.dot(h2, w1b_ref[...], preferred_element_type=f32)
    z = z + jnp.dot(x, w1x_ref[...], preferred_element_type=f32)
    z = jnp.maximum(z + fb1_ref[...], 0.0).astype(bf16)       # (TB, 64)

    # output head, zero-padded to 128 lanes -> full-lane (unmasked) store
    out_ref[...] = jnp.dot(z, w2_ref[...], preferred_element_type=f32) + ob_ref[...]


def _const_spec(arr):
    # Full-array block, constant index_map -> stays VMEM-resident across grid steps.
    return pl.BlockSpec(arr.shape, lambda i: (0, 0))


def _tile_plan(batch):
    """Tight, sublane-aligned batch tiling with >= 2 steps when there is enough work."""
    b_round = _round_up(max(batch, 1), 8)
    n_tiles = pl.cdiv(b_round, MAX_BATCH_TILE)
    if n_tiles == 1 and b_round >= 2 * MIN_SPLIT_ROWS:
        n_tiles = 2                                   # feed both TensorCores on v7x
    tb = _round_up(pl.cdiv(b_round, n_tiles), 8)
    return tb, n_tiles * tb


@jax.jit
def cnn_forward(x, prepped):
    """Fused forward pass.  `prepped` is the output of prepare_params() (built once)."""
    B = x.shape[0]
    xb = x.astype(jnp.bfloat16)                       # halves kernel-side HBM traffic

    tb, b_pad = _tile_plan(B)
    if b_pad != B:
        xb = jnp.pad(xb, ((0, b_pad - B), (0, 0)))    # at most a few sublane rows of padding
    grid = (b_pad // tb,)

    weights = (prepped["m1"], prepped["b1"], prepped["m2"], prepped["b2"],
               prepped["w1b"], prepped["w1x"], prepped["fb1"],
               prepped["w2"], prepped["ob"])

    flops = 2 * b_pad * sum(int(np.prod(prepped[k].shape))
                            for k in ("m1", "m2", "w1b", "w1x", "w2"))
    weight_bytes = sum(int(np.prod(a.shape)) * a.dtype.itemsize for a in weights)
    bytes_accessed = b_pad * IN_FEATS * 2 + weight_bytes + b_pad * OUT_LANES * 4
    cost = pl.CostEstimate(flops=int(flops), transcendentals=0,
                           bytes_accessed=int(bytes_accessed))

    out = pl.pallas_call(
        _cnn_kernel,
        out_shape=jax.ShapeDtypeStruct((b_pad, OUT_LANES), jnp.float32),
        grid=grid,
        in_specs=[pl.BlockSpec((tb, IN_FEATS), lambda i: (i, 0))]
                 + [_const_spec(a) for a in weights],
        out_specs=pl.BlockSpec((tb, OUT_LANES), lambda i: (i, 0)),
        compiler_params=pltpu.CompilerParams(
            dimension_semantics=("parallel",),
            vmem_limit_bytes=VMEM_LIMIT_BYTES),
        cost_estimate=cost,
    )(xb, *weights)

    return out[:B, :N_OUT]


def reference_forward(x, params):
    """Pure-JAX f32 reference with PyTorch conventions (NCHW, OIHW, y = x @ W.T + b)."""
    c1w, c1b, c2w, c2b, fc1w, fc1b, ow, ob = params
    B = x.shape[0]
    board = x[:, :BOARD_FEATS].reshape(B, BOARD_C, BOARD_H, BOARD_W)
    extras = x[:, BOARD_FEATS:]
    h = board
    for w, b in ((c1w, c1b), (c2w, c2b)):
        h = jax.lax.conv_general_dilated(
            h, w, window_strides=(1, 1), padding=((1, 1), (1, 1)),
            dimension_numbers=("NCHW", "OIHW", "NCHW"))
        h = jax.nn.relu(h + b[None, :, None, None])
    flat = h.reshape(B, -1)
    comb = jnp.concatenate([flat, extras], axis=1)
    comb = jax.nn.relu(comb @ fc1w.T + fc1b)
    return comb @ ow.T + ob


def matched_reference(x, prepped):
    """Pure-JAX replay of the kernel's exact bf16/fold choices (validates pallas mechanics)."""
    f32, bf16 = jnp.float32, jnp.bfloat16
    xb = x.astype(bf16)
    h1 = jnp.maximum(jnp.dot(xb[:, :BOARD_FEATS], prepped["m1"],
                             preferred_element_type=f32) + prepped["b1"], 0.0).astype(bf16)
    h2 = jnp.maximum(jnp.dot(h1, prepped["m2"],
                             preferred_element_type=f32) + prepped["b2"], 0.0).astype(bf16)
    z = (jnp.dot(h2, prepped["w1b"], preferred_element_type=f32)
         + jnp.dot(xb, prepped["w1x"], preferred_element_type=f32))
    z = jnp.maximum(z + prepped["fb1"], 0.0).astype(bf16)
    out = jnp.dot(z, prepped["w2"], preferred_element_type=f32) + prepped["ob"]
    return out[:, :N_OUT]


def init_params(key):
    ks = jax.random.split(key, 8)

    def rnd(k, shape, scale):
        return scale * jax.random.normal(k, shape, dtype=jnp.float32)

    c1w = rnd(ks[0], (4, 12, 3, 3), 0.1)     # Conv2d(12, 4, 3, padding=1)
    c1b = rnd(ks[1], (4,), 0.1)
    c2w = rnd(ks[2], (8, 4, 3, 3), 0.1)      # Conv2d(4, 8, 3, padding=1)
    c2b = rnd(ks[3], (8,), 0.1)
    fc1w = rnd(ks[4], (64, 524), 0.05)       # Linear(512 + 12, 64)
    fc1b = rnd(ks[5], (64,), 0.05)
    ow = rnd(ks[6], (3, 64), 0.05)           # Linear(64, 3)
    ob = rnd(ks[7], (3,), 0.05)
    return (c1w, c1b, c2w, c2b, fc1w, fc1b, ow, ob)


if __name__ == "__main__":
    key = jax.random.PRNGKey(0)
    pkey, xkey = jax.random.split(key)
    params = init_params(pkey)
    prepped = prepare_params(params)                            # one-time weight prep

    x = jax.random.normal(xkey, (2, IN_FEATS), dtype=jnp.float32)   # 768 board + 12 extras

    out = jax.block_until_ready(cnn_forward(x, prepped))
    assert out.shape == (2, N_OUT), out.shape

    out_np = np.asarray(out)
    matched = np.asarray(matched_reference(x, prepped))         # same bf16 fold as the kernel
    exact = np.asarray(reference_forward(x, params))            # full-f32 PyTorch-convention ref

    if not np.allclose(out_np, matched, atol=5e-3, rtol=5e-3):
        raise AssertionError(
            f"Pallas kernel mismatch vs bf16-matched reference:\n{out_np}\nvs\n{matched}")
    if not np.allclose(out_np, exact, atol=7e-2, rtol=7e-2):
        raise AssertionError(
            f"Pallas kernel drifted from f32 reference:\n{out_np}\nvs\n{exact}")
    print("KERNEL_OK")
</pallas_src>

<mosaic_0001>
module attributes {stable_mosaic.version = 11 : i64} {
  func.func @_cnn_kernel(%arg0: i32, %arg1: memref<8x780xbf16, #tpu.memory_space<vmem>>, %arg2: memref<768x256xbf16, #tpu.memory_space<vmem>>, %arg3: memref<1x256xf32, #tpu.memory_space<vmem>>, %arg4: memref<256x512xbf16, #tpu.memory_space<vmem>>, %arg5: memref<1x512xf32, #tpu.memory_space<vmem>>, %arg6: memref<512x64xbf16, #tpu.memory_space<vmem>>, %arg7: memref<780x64xbf16, #tpu.memory_space<vmem>>, %arg8: memref<1x64xf32, #tpu.memory_space<vmem>>, %arg9: memref<64x128xbf16, #tpu.memory_space<vmem>>, %arg10: memref<1x128xf32, #tpu.memory_space<vmem>>, %arg11: memref<8x128xf32, #tpu.memory_space<vmem>>) attributes {dimension_semantics = [#tpu.dimension_semantics<parallel>], iteration_bounds = array<i64: 1>, scalar_prefetch = 0 : i64, scratch_operands = 0 : i64, tpu.core_type = #tpu.core_type<tc>, window_params = [{transform_indices = @transform_0, window_bounds = array<i64: 8, 780>}, {pipeline_mode = #tpu.pipeline_mode<synchronous>, transform_indices = @transform_1, window_bounds = array<i64: 768, 256>}, {pipeline_mode = #tpu.pipeline_mode<synchronous>, transform_indices = @transform_2, window_bounds = array<i64: 1, 256>}, {pipeline_mode = #tpu.pipeline_mode<synchronous>, transform_indices = @transform_3, window_bounds = array<i64: 256, 512>}, {pipeline_mode = #tpu.pipeline_mode<synchronous>, transform_indices = @transform_4, window_bounds = array<i64: 1, 512>}, {pipeline_mode = #tpu.pipeline_mode<synchronous>, transform_indices = @transform_5, window_bounds = array<i64: 512, 64>}, {pipeline_mode = #tpu.pipeline_mode<synchronous>, transform_indices = @transform_6, window_bounds = array<i64: 780, 64>}, {pipeline_mode = #tpu.pipeline_mode<synchronous>, transform_indices = @transform_7, window_bounds = array<i64: 1, 64>}, {pipeline_mode = #tpu.pipeline_mode<synchronous>, transform_indices = @transform_8, window_bounds = array<i64: 64, 128>}, {pipeline_mode = #tpu.pipeline_mode<synchronous>, transform_indices = @transform_9, window_bounds = array<i64: 1, 128>}, {transform_indices = @transform_10, window_bounds = array<i64: 8, 128>}]} {
    %c0 = arith.constant 0 : index
    %c0_0 = arith.constant 0 : index
    %0 = vector.load %arg1[%c0, %c0_0] : memref<8x780xbf16, #tpu.memory_space<vmem>>, vector<8x780xbf16>
    %1 = vector.extract_strided_slice %0 {offsets = [0, 0], sizes = [8, 768], strides = [1, 1]} : vector<8x780xbf16> to vector<8x768xbf16>
    %c0_1 = arith.constant 0 : index
    %c0_2 = arith.constant 0 : index
    %2 = vector.load %arg2[%c0_1, %c0_2] : memref<768x256xbf16, #tpu.memory_space<vmem>>, vector<768x256xbf16>
    %cst = arith.constant dense<0.000000e+00> : vector<8x256xf32>
    %3 = tpu.matmul %1, %2, %cst {dimension_numbers = #tpu.dot_dimension_numbers<[1], [0], [0], [1], [0, 0, 1, 1], [], []>} : vector<8x768xbf16>, vector<768x256xbf16>, vector<8x256xf32> -> vector<8x256xf32>
    %c0_3 = arith.constant 0 : index
    %c0_4 = arith.constant 0 : index
    %4 = vector.load %arg3[%c0_3, %c0_4] : memref<1x256xf32, #tpu.memory_space<vmem>>, vector<1x256xf32>
    %5 = vector.broadcast %4 : vector<1x256xf32> to vector<8x256xf32>
    %6 = arith.addf %3, %5 : vector<8x256xf32>
    %cst_5 = arith.constant 0.000000e+00 : f32
    %7 = vector.broadcast %cst_5 : f32 to vector<8x256xf32>
    %8 = arith.maximumf %6, %7 : vector<8x256xf32>
    %9 = arith.truncf %8 : vector<8x256xf32> to vector<8x256xbf16>
    %c0_6 = arith.constant 0 : index
    %c0_7 = arith.constant 0 : index
    %10 = vector.load %arg4[%c0_6, %c0_7] : memref<256x512xbf16, #tpu.memory_space<vmem>>, vector<256x512xbf16>
    %cst_8 = arith.constant dense<0.000000e+00> : vector<8x512xf32>
    %11 = tpu.matmul %9, %10, %cst_8 {dimension_numbers = #tpu.dot_dimension_numbers<[1], [0], [0], [1], [0, 0, 1, 1], [], []>} : vector<8x256xbf16>, vector<256x512xbf16>, vector<8x512xf32> -> vector<8x512xf32>
    %c0_9 = arith.constant 0 : index
    %c0_10 = arith.constant 0 : index
    %12 = vector.load %arg5[%c0_9, %c0_10] : memref<1x512xf32, #tpu.memory_space<vmem>>, vector<1x512xf32>
    %13 = vector.broadcast %12 : vector<1x512xf32> to vector<8x512xf32>
    %14 = arith.addf %11, %13 : vector<8x512xf32>
    %cst_11 = arith.constant 0.000000e+00 : f32
    %15 = vector.broadcast %cst_11 : f32 to vector<8x512xf32>
    %16 = arith.maximumf %14, %15 : vector<8x512xf32>
    %17 = arith.truncf %16 : vector<8x512xf32> to vector<8x512xbf16>
    %c0_12 = arith.constant 0 : index
    %c0_13 = arith.constant 0 : index
    %18 = vector.load %arg6[%c0_12, %c0_13] : memref<512x64xbf16, #tpu.memory_space<vmem>>, vector<512x64xbf16>
    %cst_14 = arith.constant dense<0.000000e+00> : vector<8x64xf32>
    %19 = tpu.matmul %17, %18, %cst_14 {dimension_numbers = #tpu.dot_dimension_numbers<[1], [0], [0], [1], [0, 0, 1, 1], [], []>} : vector<8x512xbf16>, vector<512x64xbf16>, vector<8x64xf32> -> vector<8x64xf32>
    %c0_15 = arith.constant 0 : index
    %c0_16 = arith.constant 0 : index
    %20 = vector.load %arg7[%c0_15, %c0_16] : memref<780x64xbf16, #tpu.memory_space<vmem>>, vector<780x64xbf16>
    %cst_17 = arith.constant dense<0.000000e+00> : vector<8x64xf32>
    %21 = tpu.matmul %0, %20, %cst_17 {dimension_numbers = #tpu.dot_dimension_numbers<[1], [0], [0], [1], [0, 0, 1, 1], [], []>} : vector<8x780xbf16>, vector<780x64xbf16>, vector<8x64xf32> -> vector<8x64xf32>
    %22 = arith.addf %19, %21 : vector<8x64xf32>
    %c0_18 = arith.constant 0 : index
    %c0_19 = arith.constant 0 : index
    %23 = vector.load %arg8[%c0_18, %c0_19] : memref<1x64xf32, #tpu.memory_space<vmem>>, vector<1x64xf32>
    %24 = vector.broadcast %23 : vector<1x64xf32> to vector<8x64xf32>
    %25 = arith.addf %22, %24 : vector<8x64xf32>
    %cst_20 = arith.constant 0.000000e+00 : f32
    %26 = vector.broadcast %cst_20 : f32 to vector<8x64xf32>
    %27 = arith.maximumf %25, %26 : vector<8x64xf32>
    %28 = arith.truncf %27 : vector<8x64xf32> to vector<8x64xbf16>
    %c0_21 = arith.constant 0 : index
    %c0_22 = arith.constant 0 : index
    %29 = vector.load %arg9[%c0_21, %c0_22] : memref<64x128xbf16, #tpu.memory_space<vmem>>, vector<64x128xbf16>
    %cst_23 = arith.constant dense<0.000000e+00> : vector<8x128xf32>
    %30 = tpu.matmul %28, %29, %cst_23 {dimension_numbers = #tpu.dot_dimension_numbers<[1], [0], [0], [1], [0, 0, 1, 1], [], []>} : vector<8x64xbf16>, vector<64x128xbf16>, vector<8x128xf32> -> vector<8x128xf32>
    %c0_24 = arith.constant 0 : index
    %c0_25 = arith.constant 0 : index
    %31 = vector.load %arg10[%c0_24, %c0_25] : memref<1x128xf32, #tpu.memory_space<vmem>>, vector<1x128xf32>
    %32 = vector.broadcast %31 : vector<1x128xf32> to vector<8x128xf32>
    %33 = arith.addf %30, %32 : vector<8x128xf32>
    %c0_26 = arith.constant 0 : index
    %c0_27 = arith.constant 0 : index
    %34 = vector.load %arg11[%c0_26, %c0_27] : memref<8x128xf32, #tpu.memory_space<vmem>>, vector<8x128xf32>
    tpu.vector_store %arg11[%c0_26, %c0_27], %33 {strides = array<i32>} : memref<8x128xf32, #tpu.memory_space<vmem>>, vector<8x128xf32>,
    return
  }
  func.func @transform_0(%arg0: i32) -> (i32, i32) {
    %c0_i32 = arith.constant 0 : i32
    %c0_i32_0 = arith.constant 0 : i32
    return %arg0, %c0_i32 : i32, i32
  }
  func.func @transform_1(%arg0: i32) -> (i32, i32) {
    %c0_i32 = arith.constant 0 : i32
    %c0_i32_0 = arith.constant 0 : i32
    %c0_i32_1 = arith.constant 0 : i32
    return %c0_i32, %c0_i32_0 : i32, i32
  }
  func.func @transform_2(%arg0: i32) -> (i32, i32) {
    %c0_i32 = arith.constant 0 : i32
    %c0_i32_0 = arith.constant 0 : i32
    %c0_i32_1 = arith.constant 0 : i32
    return %c0_i32, %c0_i32_0 : i32, i32
  }
  func.func @transform_3(%arg0: i32) -> (i32, i32) {
    %c0_i32 = arith.constant 0 : i32
    %c0_i32_0 = arith.constant 0 : i32
    %c0_i32_1 = arith.constant 0 : i32
    return %c0_i32, %c0_i32_0 : i32, i32
  }
  func.func @transform_4(%arg0: i32) -> (i32, i32) {
    %c0_i32 = arith.constant 0 : i32
    %c0_i32_0 = arith.constant 0 : i32
    %c0_i32_1 = arith.constant 0 : i32
    return %c0_i32, %c0_i32_0 : i32, i32
  }
  func.func @transform_5(%arg0: i32) -> (i32, i32) {
    %c0_i32 = arith.constant 0 : i32
    %c0_i32_0 = arith.constant 0 : i32
    %c0_i32_1 = arith.constant 0 : i32
    return %c0_i32, %c0_i32_0 : i32, i32
  }
  func.func @transform_6(%arg0: i32) -> (i32, i32) {
    %c0_i32 = arith.constant 0 : i32
    %c0_i32_0 = arith.constant 0 : i32
    %c0_i32_1 = arith.constant 0 : i32
    return %c0_i32, %c0_i32_0 : i32, i32
  }
  func.func @transform_7(%arg0: i32) -> (i32, i32) {
    %c0_i32 = arith.constant 0 : i32
    %c0_i32_0 = arith.constant 0 : i32
    %c0_i32_1 = arith.constant 0 : i32
    return %c0_i32, %c0_i32_0 : i32, i32
  }
  func.func @transform_8(%arg0: i32) -> (i32, i32) {
    %c0_i32 = arith.constant 0 : i32
    %c0_i32_0 = arith.constant 0 : i32
    %c0_i32_1 = arith.constant 0 : i32
    return %c0_i32, %c0_i32_0 : i32, i32
  }
  func.func @transform_9(%arg0: i32) -> (i32, i32) {
    %c0_i32 = arith.constant 0 : i32
    %c0_i32_0 = arith.constant 0 : i32
    %c0_i32_1 = arith.constant 0 : i32
    return %c0_i32, %c0_i32_0 : i32, i32
  }
  func.func @transform_10(%arg0: i32) -> (i32, i32) {
    %c0_i32 = arith.constant 0 : i32
    %c0_i32_0 = arith.constant 0 : i32
    return %arg0, %c0_i32 : i32, i32
  }
}

</mosaic_0001>

<bundles_post_ra>
// kernel: cnn_forward.1
= control target key start
LH: loop header
LB: loop body
LE: loop exit
PB: predicated region body
PF: predicated region fallthrough
CT: control target
= control target key end

     0   :  { %15 = vsyncpa [#allocation3], 0  ;;  %s3045_s13 = smov [#allocation2]   ;;  %s3750_s0 = inlined_call_operand.vmem [shape: bf16[8,780], index: 0, kind: input, shape index: {}]   ;;  %s3751_s1 = inlined_call_operand.vmem [shape: bf16[768,256], index: 1, kind: input, shape index: {}]   ;;  %s3752_s2 = inlined_call_operand.vmem [shape: f32[1,256], index: 2, kind: input, shape index: {}]   ;;  %s3753_s3 = inlined_call_operand.hbm [shape: bf16[256,512], index: 3, kind: input, shape index: {}]   ;;  %s3754_s4 = inlined_call_operand.vmem [shape: f32[1,512], index: 4, kind: input, shape index: {}]   ;;  %s3755_s5 = inlined_call_operand.vmem [shape: bf16[512,64], index: 5, kind: input, shape index: {}]   ;;  %s3756_s6 = inlined_call_operand.vmem [shape: bf16[780,64], index: 6, kind: input, shape index: {}]   ;;  %s3757_s7 = inlined_call_operand.vmem [shape: f32[1,64], index: 7, kind: input, shape index: {}]   ;;  %s3758_s8 = inlined_call_operand.vmem [shape: bf16[64,128], index: 8, kind: input, shape index: {}]   ;;  %s3759_s9 = inlined_call_operand.vmem [shape: f32[1,128], index: 9, kind: input, shape index: {}]   ;;  %s3760_s10 = inlined_call_operand.vmem [shape: f32[8,128], index: 10, kind: output, shape index: {}]  }
   0x1   :  { %s27_s14 = sshll.u32 %s3045_s13, 4  ;;  %s3021_s17 = scalar_lea.hbm %s3753_s3, 8192  ;;  %s28_s14 = int_to_ptr.vmem [resolvable:$true] %s27_s14 }
   0x2   :  { %p3022_p0 = scmp.ne.s32.totalorder %s3753_s3, %s3021_s17  ;;  %p3025_p1 = scmp.lt.u32.totalorder %s3021_s17, %s3753_s3 }
   0x4   :  { %p3027_p2 = pnand %p3025_p1, %p3022_p0 }
   0x6   :  { %3030 = shalt.err (!%p3027_p2)
}
   0x7   :  { %s3031_s22 = scalar_lea.vmem %s28_s14, 8192  ;;  %p3036_p4 = scmp.lt.s32.totalorder %s28_s14, %s28_s14 }
   0x8   :  { %p3032_p3 = scmp.ne.s32.totalorder %s28_s14, %s3031_s22  ;;  %p3037_p5 = scmp.lt.s32.totalorder %s3031_s22, %s3031_s22 }
   0xa   :  { %p3038_p6 = por %p3037_p5, %p3036_p4 }
   0xc   :  { %p3039_p7 = pnand %p3038_p6, %p3032_p3 }
   0xe   :  { %3042 = shalt.err (!%p3039_p7)
}
   0xf   :  { %s3046_s23 = smov 256   ;;  %s3047_s24 = smov 16  }
  0x10   :  { %33 = dma.hbm_to_vmem [thread:$0]  %s3753_s3, 8192, %s28_s14, [#allocation3], %s3046_s23, %s3046_s23, %s3047_s24  }
  0x11   :  { %3043 = dma.done.wait [#allocation3], 8192  }
  0x12   :  { %3044 = vsyncadd [#allocation3], 4294959104  ;;  %v2689_v0 = vld [vmem:[%s3751_s1 + $0x4] ss:$8 sps:$4 sm:$0xff]   ;;  %v2691_v1 = vld [vmem:[%s3751_s1] ss:$8 sps:$4 sm:$0xff]  }
  0x13   :  { %663 = vmatprep.subr.bf16.mxu0 %v2689_v0  ;;  %v2692_v2 = vld [vmem:[%s3751_s1 + $0x14] ss:$8 sps:$4 sm:$0xff]   ;;  %v2694_v3 = vld [vmem:[%s3751_s1 + $0x10] ss:$8 sps:$4 sm:$0xff]   ;;  %v2695_v4 = vld [vmem:[%s3751_s1 + $0x24] ss:$8 sps:$4 sm:$0xff]  }
  0x14   :  { %664 = vmatpush1.bf16.msra.mxu0 %v2691_v1  ;;  %v2697_v5 = vld [vmem:[%s3751_s1 + $0x20] ss:$8 sps:$4 sm:$0xff]   ;;  %v2698_v6 = vld [vmem:[%s3751_s1 + $0x34] ss:$8 sps:$4 sm:$0xff]   ;;  %v2700_v7 = vld [vmem:[%s3751_s1 + $0x30] ss:$8 sps:$4 sm:$0xff]  }
  0x15   :  { %665 = vmatprep.subr.bf16.mxu0 %v2692_v2  ;;  %v2701_v8 = vld [vmem:[%s3751_s1 + $0x44] ss:$8 sps:$4 sm:$0xff]   ;;  %v2703_v9 = vld [vmem:[%s3751_s1 + $0x40] ss:$8 sps:$4 sm:$0xff]   ;;  %v2704_v10 = vld [vmem:[%s3751_s1 + $0x54] ss:$8 sps:$4 sm:$0xff]  }
  0x16   :  { %v2706_v11 = vld [vmem:[%s3751_s1 + $0x50] ss:$8 sps:$4 sm:$0xff]   ;;  %v2707_v12 = vld [vmem:[%s3751_s1 + $0x64] ss:$8 sps:$4 sm:$0xff]   ;;  %v2709_v15 = vld [vmem:[%s3751_s1 + $0x60] ss:$8 sps:$4 sm:$0xff]  }
  0x17   :  { %v50_v13 = vld [vmem:[%s3750_s0] sm:$0xff]  ;;  %v2710_v16 = vld [vmem:[%s3751_s1 + $0x74] ss:$8 sps:$4 sm:$0xff]   ;;  %v2712_v17 = vld [vmem:[%s3751_s1 + $0x70] ss:$8 sps:$4 sm:$0xff]   ;;  %vm1748_vm0 = vcmask 1045504  }
  0x18   :  { %666 = vmatpush1.bf16.msra.mxu0 %v2694_v3  ;;  %v3159_v14 = vcombine.high %v50_v13, %v50_v13  ;;  %v2713_v18 = vld [vmem:[%s3751_s1 + $0x84] ss:$8 sps:$4 sm:$0xff]   ;;  %v2715_v19 = vld [vmem:[%s3751_s1 + $0x80] ss:$8 sps:$4 sm:$0xff]   ;;  %v2716_v20 = vld [vmem:[%s3751_s1 + $0x94] ss:$8 sps:$4 sm:$0xff]   ;;  %v3227_v36 = vcombine.low %v50_v13, %v50_v13 }
  0x19   :  { %667 = vmatprep.subr.bf16.mxu0 %v2695_v4  ;;  %v2718_v21 = vld [vmem:[%s3751_s1 + $0x90] ss:$8 sps:$4 sm:$0xff]   ;;  %v2719_v22 = vld [vmem:[%s3751_s1 + $0xa4] ss:$8 sps:$4 sm:$0xff]   ;;  %v2721_v23 = vld [vmem:[%s3751_s1 + $0xa0] ss:$8 sps:$4 sm:$0xff]  }
  0x1a   :  { %695 = vmatprep.mubr.bf16.mxu0 %v3159_v14  ;;  %v2722_v24 = vld [vmem:[%s3751_s1 + $0xb4] ss:$8 sps:$4 sm:$0xff]   ;;  %v2724_v25 = vld [vmem:[%s3751_s1 + $0xb0] ss:$8 sps:$4 sm:$0xff]   ;;  %v2725_v26 = vld [vmem:[%s3751_s1 + $0xc4] ss:$8 sps:$4 sm:$0xff]  }
  0x1b   :  { %v2727_v27 = vld [vmem:[%s3751_s1 + $0xc0] ss:$8 sps:$4 sm:$0xff]   ;;  %v2728_v28 = vld [vmem:[%s3751_s1 + $0xd4] ss:$8 sps:$4 sm:$0xff]   ;;  %v2730_v29 = vld [vmem:[%s3751_s1 + $0xd0] ss:$8 sps:$4 sm:$0xff]  }
  0x1c   :  { %668 = vmatpush1.bf16.msra.mxu0 %v2697_v5  ;;  %v2731_v30 = vld [vmem:[%s3751_s1 + $0xe4] ss:$8 sps:$4 sm:$0xff]   ;;  %v2733_v31 = vld [vmem:[%s3751_s1 + $0xe0] ss:$8 sps:$4 sm:$0xff]   ;;  %v2734_v32 = vld [vmem:[%s3751_s1 + $0xf4] ss:$8 sps:$4 sm:$0xff]  }
  0x1d   :  { %669 = vmatprep.subr.bf16.mxu0 %v2698_v6  ;;  %v2736_v33 = vld [vmem:[%s3751_s1 + $0xf0] ss:$8 sps:$4 sm:$0xff]   ;;  %v2741_v34 = vld [vmem:[%s3751_s1 + $0x104] ss:$8 sps:$4 sm:$0xff]   ;;  %v2739_v37 = vld [vmem:[%s3751_s1 + $0x100] ss:$8 sps:$4 sm:$0xff]  }
  0x1e   :  { %v3225_v35 = vld [vmem:[%s3750_s0 + $0x8] sm:$0xff]  ;;  %v2744_v39 = vld [vmem:[%s3751_s1 + $0x114] ss:$8 sps:$4 sm:$0xff]   ;;  %v2841_v41 = vld [vmem:[#allocation2] ss:$16 sps:$4 sm:$0xff]   ;;  %vm3049_vm1 = vmmov 0  }
  0x1f   :  { %v3234_v38 = vcombine.high %v3225_v35, %v3225_v35  ;;  %v2839_v40 = vld [vmem:[#allocation2 + $0x4] ss:$16 sps:$4 sm:$0xff]   ;;  %v2742_v42 = vld [vmem:[%s3751_s1 + $0x110] ss:$8 sps:$4 sm:$0xff]   ;;  %v2745_v47 = vld [vmem:[%s3751_s1 + $0x120] ss:$8 sps:$4 sm:$0xff]  }
  0x20   :  { %670 = vmatpush1.bf16.msra.mxu0 %v2700_v7  ;;  %v2842_v43 = vld [vmem:[#allocation2 + $0x24] ss:$16 sps:$4 sm:$0xff]   ;;  %1196 = vmatprep.subr.bf16.mxu1 %v2839_v40  ;;  %v2844_v45 = vld [vmem:[#allocation2 + $0x20] ss:$16 sps:$4 sm:$0xff]   ;;  %v3341_v40 = vcombine.low %v3225_v35, %v3225_v35  ;;  %vm1744_vm2 = vcmask 97280   ;;  %vm2233_vm3 = vcmask 523264  }
  0x21   :  { %671 = vmatprep.subr.bf16.mxu0 %v2701_v8  ;;  %v2747_v44 = vld [vmem:[%s3751_s1 + $0x124] ss:$8 sps:$4 sm:$0xff]   ;;  %1197 = vmatpush1.bf16.msra.mxu1 %v2841_v41  ;;  %v2750_v48 = vld [vmem:[%s3751_s1 + $0x134] ss:$8 sps:$4 sm:$0xff]   ;;  %v2847_v49 = vld [vmem:[#allocation2 + $0x40] ss:$16 sps:$4 sm:$0xff]  }
  0x22   :  { %1198 = vmatprep.subr.bf16.mxu1 %v2842_v43  ;;  %v2845_v46 = vld [vmem:[#allocation2 + $0x44] ss:$16 sps:$4 sm:$0xff]   ;;  %v2748_v51 = vld [vmem:[%s3751_s1 + $0x130] ss:$8 sps:$4 sm:$0xff]   ;;  %v2751_v55 = vld [vmem:[%s3751_s1 + $0x140] ss:$8 sps:$4 sm:$0xff]  }
  0x23   :  { %v2848_v50 = vld [vmem:[#allocation2 + $0x64] ss:$16 sps:$4 sm:$0xff]   ;;  %v2850_v53 = vld [vmem:[#allocation2 + $0x60] ss:$16 sps:$4 sm:$0xff]  }
  0x24   :  { %672 = vmatpush1.bf16.msra.mxu0 %v2703_v9  ;;  %v2753_v52 = vld [vmem:[%s3751_s1 + $0x144] ss:$8 sps:$4 sm:$0xff]   ;;  %v2756_v56 = vld [vmem:[%s3751_s1 + $0x154] ss:$8 sps:$4 sm:$0xff]   ;;  %v2853_v57 = vld [vmem:[#allocation2 + $0x80] ss:$16 sps:$4 sm:$0xff]  }
  0x25   :  { %673 = vmatprep.subr.bf16.mxu0 %v2704_v10  ;;  %1199 = vmatpush1.bf16.msra.mxu1 %v2844_v45  ;;  %v2851_v54 = vld [vmem:[#allocation2 + $0x84] ss:$16 sps:$4 sm:$0xff]   ;;  %v2754_v59 = vld [vmem:[%s3751_s1 + $0x150] ss:$8 sps:$4 sm:$0xff]   ;;  %v2757_v63 = vld [vmem:[%s3751_s1 + $0x160] ss:$8 sps:$4 sm:$0xff]  }
  0x26   :  { %1200 = vmatprep.subr.bf16.mxu1 %v2845_v46  ;;  %v2854_v58 = vld [vmem:[#allocation2 + $0xa4] ss:$16 sps:$4 sm:$0xff]   ;;  %v2856_v61 = vld [vmem:[#allocation2 + $0xa0] ss:$16 sps:$4 sm:$0xff]  }
  0x27   :  { %v2759_v60 = vld [vmem:[%s3751_s1 + $0x164] ss:$8 sps:$4 sm:$0xff]   ;;  %v2762_v0 = vld [vmem:[%s3751_s1 + $0x174] ss:$8 sps:$4 sm:$0xff]   ;;  %v2859_v1 = vld [vmem:[#allocation2 + $0xc0] ss:$16 sps:$4 sm:$0xff]  }
  0x28   :  { %674 = vmatpush1.bf16.msra.mxu0 %v2706_v11  ;;  %v2857_v62 = vld [vmem:[#allocation2 + $0xc4] ss:$16 sps:$4 sm:$0xff]   ;;  %v2760_v3 = vld [vmem:[%s3751_s1 + $0x170] ss:$8 sps:$4 sm:$0xff]   ;;  %v2763_v7 = vld [vmem:[%s3751_s1 + $0x180] ss:$8 sps:$4 sm:$0xff]  }
  0x29   :  { %675 = vmatprep.subr.bf16.mxu0 %v2707_v12  ;;  %1201 = vmatpush1.bf16.msra.mxu1 %v2847_v49  ;;  %v2860_v2 = vld [vmem:[#allocation2 + $0xe4] ss:$16 sps:$4 sm:$0xff]   ;;  %v2862_v5 = vld [vmem:[#allocation2 + $0xe0] ss:$16 sps:$4 sm:$0xff]  }
  0x2a   :  { %1202 = vmatprep.subr.bf16.mxu1 %v2848_v50  ;;  %v2765_v4 = vld [vmem:[%s3751_s1 + $0x184] ss:$8 sps:$4 sm:$0xff]   ;;  %v2768_v8 = vld [vmem:[%s3751_s1 + $0x194] ss:$8 sps:$4 sm:$0xff]   ;;  %v2865_v9 = vld [vmem:[#allocation2 + $0x100] ss:$16 sps:$4 sm:$0xff]  }
  0x2b   :  { %v2863_v6 = vld [vmem:[#allocation2 + $0x104] ss:$16 sps:$4 sm:$0xff]   ;;  %v2766_v11 = vld [vmem:[%s3751_s1 + $0x190] ss:$8 sps:$4 sm:$0xff]  }
  0x2c   :  { %676 = vmatpush1.bf16.msra.mxu0 %v2709_v15  ;;  %v2866_v10 = vld [vmem:[#allocation2 + $0x124] ss:$16 sps:$4 sm:$0xff]   ;;  %v2868_v13 = vld [vmem:[#allocation2 + $0x120] ss:$16 sps:$4 sm:$0xff]  }
  0x2d   :  { %677 = vmatprep.subr.bf16.mxu0 %v2710_v16  ;;  %1203 = vmatpush1.bf16.msra.mxu1 %v2850_v53  ;;  %v2771_v12 = vld [vmem:[%s3751_s1 + $0x1a4] ss:$8 sps:$4 sm:$0xff]   ;;  %v2769_v16 = vld [vmem:[%s3751_s1 + $0x1a0] ss:$8 sps:$4 sm:$0xff]   ;;  %v2794_v41 = vld [vmem:[%s3751_s1 + $0x214] ss:$8 sps:$4 sm:$0xff]  }
  0x2e   :  { %1204 = vmatprep.subr.bf16.mxu1 %v2851_v54  ;;  %v2869_v15 = vld [vmem:[#allocation2 + $0x144] ss:$16 sps:$4 sm:$0xff]   ;;  %v2792_v43 = vld [vmem:[%s3751_s1 + $0x210] ss:$8 sps:$4 sm:$0xff]  }
  0x2f   :  { %v2797_v35 = vld [vmem:[%s3751_s1 + $0x224] ss:$8 sps:$4 sm:$0xff]   ;;  %v2800_v45 = vld [vmem:[%s3751_s1 + $0x234] ss:$8 sps:$4 sm:$0xff]   ;;  %v2798_v46 = vld [vmem:[%s3751_s1 + $0x230] ss:$8 sps:$4 sm:$0xff]  }
  0x30   :  { %678 = vmatpush1.bf16.msra.mxu0 %v2712_v17  ;;  %v2774_v17 = vld [vmem:[%s3751_s1 + $0x1b4] ss:$8 sps:$4 sm:$0xff]   ;;  %v2804_v50 = vld [vmem:[%s3751_s1 + $0x250] ss:$8 sps:$4 sm:$0xff]  }
  0x31   :  { %679 = vmatprep.subr.bf16.mxu0 %v2713_v18  ;;  %1205 = vmatpush1.bf16.msra.mxu1 %v2853_v57  ;;  %v2871_v18 = vld [vmem:[#allocation2 + $0x140] ss:$16 sps:$4 sm:$0xff]   ;;  %v2806_v49 = vld [vmem:[%s3751_s1 + $0x254] ss:$8 sps:$4 sm:$0xff]  }
  0x32   :  { %1206 = vmatprep.subr.bf16.mxu1 %v2854_v58  ;;  %v2812_v53 = vld [vmem:[%s3751_s1 + $0x274] ss:$8 sps:$4 sm:$0xff]   ;;  %v2810_v54 = vld [vmem:[%s3751_s1 + $0x270] ss:$8 sps:$4 sm:$0xff]  }
  0x33   :  { %v2818_v57 = vld [vmem:[%s3751_s1 + $0x294] ss:$8 sps:$4 sm:$0xff]   ;;  %v2816_v58 = vld [vmem:[%s3751_s1 + $0x290] ss:$8 sps:$4 sm:$0xff]  }
  0x34   :  { %680 = vmatpush1.bf16.msra.mxu0 %v2715_v19  ;;  %v2872_v19 = vld [vmem:[#allocation2 + $0x164] ss:$16 sps:$4 sm:$0xff]  }
  0x35   :  { %681 = vmatprep.subr.bf16.mxu0 %v2716_v20  ;;  %1207 = vmatpush1.bf16.msra.mxu1 %v2856_v61  ;;  %v2772_v20 = vld [vmem:[%s3751_s1 + $0x1b0] ss:$8 sps:$4 sm:$0xff]   ;;  %v2824_v61 = vld [vmem:[%s3751_s1 + $0x2b4] ss:$8 sps:$4 sm:$0xff]  }
  0x36   :  { %1208 = vmatprep.subr.bf16.mxu1 %v2857_v62  ;;  %v2822_v62 = vld [vmem:[%s3751_s1 + $0x2b0] ss:$8 sps:$4 sm:$0xff]  }
  0x38   :  { %682 = vmatpush1.bf16.msra.mxu0 %v2718_v21  ;;  %v2777_v21 = vld [vmem:[%s3751_s1 + $0x1c4] ss:$8 sps:$4 sm:$0xff]  }
  0x39   :  { %683 = vmatprep.subr.bf16.mxu0 %v2719_v22  ;;  %1209 = vmatpush1.bf16.msra.mxu1 %v2859_v1  ;;  %v2874_v22 = vld [vmem:[#allocation2 + $0x160] ss:$16 sps:$4 sm:$0xff]   ;;  %v2830_v1 = vld [vmem:[%s3751_s1 + $0x2d4] ss:$8 sps:$4 sm:$0xff]  }
  0x3a   :  { %1210 = vmatprep.subr.bf16.mxu1 %v2860_v2  ;;  %v2828_v2 = vld [vmem:[%s3751_s1 + $0x2d0] ss:$8 sps:$4 sm:$0xff]  }
  0x3c   :  { %684 = vmatpush1.bf16.msra.mxu0 %v2721_v23  ;;  %v2875_v23 = vld [vmem:[#allocation2 + $0x184] ss:$16 sps:$4 sm:$0xff]  }
  0x3d   :  { %685 = vmatprep.subr.bf16.mxu0 %v2722_v24  ;;  %1211 = vmatpush1.bf16.msra.mxu1 %v2862_v5  ;;  %v2775_v24 = vld [vmem:[%s3751_s1 + $0x1c0] ss:$8 sps:$4 sm:$0xff]   ;;  %v2836_v5 = vld [vmem:[%s3751_s1 + $0x2f4] ss:$8 sps:$4 sm:$0xff]  }
  0x3e   :  { %1212 = vmatprep.subr.bf16.mxu1 %v2863_v6  ;;  %v2834_v6 = vld [vmem:[%s3751_s1 + $0x2f0] ss:$8 sps:$4 sm:$0xff]  }
  0x40   :  { %686 = vmatpush1.bf16.msra.mxu0 %v2724_v25  ;;  %v2780_v25 = vld [vmem:[%s3751_s1 + $0x1d4] ss:$8 sps:$4 sm:$0xff]  }
  0x41   :  { %687 = vmatprep.subr.bf16.mxu0 %v2725_v26  ;;  %1213 = vmatpush1.bf16.msra.mxu1 %v2865_v9  ;;  %v2877_v26 = vld [vmem:[#allocation2 + $0x180] ss:$16 sps:$4 sm:$0xff]  }
  0x42   :  { %1214 = vmatprep.subr.bf16.mxu1 %v2866_v10  ;;  %v2883_v9 = vld [vmem:[#allocation2 + $0x1c0] ss:$16 sps:$4 sm:$0xff]   ;;  %v2884_v10 = vld [vmem:[#allocation2 + $0x1e4] ss:$16 sps:$4 sm:$0xff]  }
  0x44   :  { %688 = vmatpush1.bf16.msra.mxu0 %v2727_v27  ;;  %v2878_v27 = vld [vmem:[#allocation2 + $0x1a4] ss:$16 sps:$4 sm:$0xff]  }
  0x45   :  { %689 = vmatprep.subr.bf16.mxu0 %v2728_v28  ;;  %1215 = vmatpush1.bf16.msra.mxu1 %v2868_v13  ;;  %v2778_v28 = vld [vmem:[%s3751_s1 + $0x1d0] ss:$8 sps:$4 sm:$0xff]   ;;  %v152_v13 = vlaneseq }
  0x46   :  { %1216 = vmatprep.subr.bf16.mxu1 %v2869_v15 }
  0x47   :  { %v3445_v15 = vshrl.u32 %v152_v13, 7  ;;  %v2926_v13 = vld [vmem:[#allocation2 + $0x1a8] ss:$16 sps:$4 sm:$0xff]  }
  0x48   :  { %690 = vmatpush1.bf16.msra.mxu0 %v2730_v29  ;;  %v2783_v29 = vld [vmem:[%s3751_s1 + $0x1e4] ss:$8 sps:$4 sm:$0xff]  }
  0x49   :  { %691 = vmatprep.subr.bf16.mxu0 %v2731_v30  ;;  %1217 = vmatpush1.bf16.msra.mxu1 %v2871_v18  ;;  %v2880_v30 = vld [vmem:[#allocation2 + $0x1a0] ss:$16 sps:$4 sm:$0xff]   ;;  %v158_v18 = vsub.s32 1, %v3445_v15 }
  0x4a   :  { %1218 = vmatprep.subr.bf16.mxu1 %v2872_v19 }
  0x4c   :  { %692 = vmatpush1.bf16.msra.mxu0 %v2733_v31  ;;  %v2781_v31 = vld [vmem:[%s3751_s1 + $0x1e0] ss:$8 sps:$4 sm:$0xff]  }
  0x4d   :  { %693 = vmatprep.subr.bf16.mxu0 %v2734_v32  ;;  %1219 = vmatpush1.bf16.msra.mxu1 %v2874_v22  ;;  %v2786_v32 = vld [vmem:[%s3751_s1 + $0x1f4] ss:$8 sps:$4 sm:$0xff]  }
  0x4e   :  { %1220 = vmatprep.subr.bf16.mxu1 %v2875_v23 }
  0x50   :  { %694 = vmatpush1.bf16.msra.mxu0 %v2736_v33  ;;  %v2784_v33 = vld [vmem:[%s3751_s1 + $0x1f0] ss:$8 sps:$4 sm:$0xff]  }
  0x51   :  { %704 = vmatprep.subr.bf16.mxu0 %v2741_v34  ;;  %1221 = vmatpush1.bf16.msra.mxu1 %v2877_v26  ;;  %v2791_v34 = vld [vmem:[%s3751_s1 + $0x204] ss:$8 sps:$4 sm:$0xff]  }
  0x52   :  { %1222 = vmatprep.subr.bf16.mxu1 %v2878_v27 }
  0x53   :  { %696 = vmatmul.mubr.bf16.vlgmr.msra.gmra.mrb[0].mxu0 %v3227_v36 }
  0x54   :  { %705 = vmatpush1.bf16.msra.mxu0 %v2739_v37  ;;  %736 = vmatprep.mubr.bf16.mxu0 %v3234_v38  ;;  %v3334_v37 = vld [vmem:[%s3750_s0 + $0x10] sm:$0xff] }
  0x55   :  { %706 = vmatprep.subr.bf16.mxu0 %v2744_v39  ;;  %1223 = vmatpush1.bf16.msra.mxu1 %v2880_v30  ;;  %v2789_v39 = vld [vmem:[%s3751_s1 + $0x200] ss:$8 sps:$4 sm:$0xff]  }
  0x56   :  { %v2887_v30 = vld [vmem:[#allocation2 + $0x8] ss:$16 sps:$4 sm:$0xff]  }
  0x58   :  { %707 = vmatpush1.bf16.msra.mxu0 %v2742_v42  ;;  %v3348_v42 = vcombine.high %v3334_v37, %v3334_v37 }
  0x59   :  { %708 = vmatprep.subr.bf16.mxu0 %v2747_v44  ;;  %v2795_v44 = vld [vmem:[%s3751_s1 + $0x220] ss:$8 sps:$4 sm:$0xff]  }
  0x5c   :  { %709 = vmatpush1.bf16.msra.mxu0 %v2745_v47  ;;  %v2803_v47 = vld [vmem:[%s3751_s1 + $0x244] ss:$8 sps:$4 sm:$0xff]  }
  0x5d   :  { %710 = vmatprep.subr.bf16.mxu0 %v2750_v48  ;;  %v2801_v48 = vld [vmem:[%s3751_s1 + $0x240] ss:$8 sps:$4 sm:$0xff]  }
  0x60   :  { %711 = vmatpush1.bf16.msra.mxu0 %v2748_v51  ;;  %v2809_v51 = vld [vmem:[%s3751_s1 + $0x264] ss:$8 sps:$4 sm:$0xff]  }
  0x61   :  { %712 = vmatprep.subr.bf16.mxu0 %v2753_v52  ;;  %v2807_v52 = vld [vmem:[%s3751_s1 + $0x260] ss:$8 sps:$4 sm:$0xff]  }
  0x64   :  { %713 = vmatpush1.bf16.msra.mxu0 %v2751_v55  ;;  %v2815_v55 = vld [vmem:[%s3751_s1 + $0x284] ss:$8 sps:$4 sm:$0xff]  }
  0x65   :  { %714 = vmatprep.subr.bf16.mxu0 %v2756_v56  ;;  %v2813_v56 = vld [vmem:[%s3751_s1 + $0x280] ss:$8 sps:$4 sm:$0xff]  }
  0x68   :  { %715 = vmatpush1.bf16.msra.mxu0 %v2754_v59  ;;  %v2821_v59 = vld [vmem:[%s3751_s1 + $0x2a4] ss:$8 sps:$4 sm:$0xff]  }
  0x69   :  { %716 = vmatprep.subr.bf16.mxu0 %v2759_v60  ;;  %v2819_v60 = vld [vmem:[%s3751_s1 + $0x2a0] ss:$8 sps:$4 sm:$0xff]  }
  0x6c   :  { %717 = vmatpush1.bf16.msra.mxu0 %v2757_v63  ;;  %v2827_v63 = vld [vmem:[%s3751_s1 + $0x2c4] ss:$8 sps:$4 sm:$0xff]  }
  0x6d   :  { %718 = vmatprep.subr.bf16.mxu0 %v2762_v0  ;;  %v2825_v0 = vld [vmem:[%s3751_s1 + $0x2c0] ss:$8 sps:$4 sm:$0xff]  }
  0x70   :  { %719 = vmatpush1.bf16.msra.mxu0 %v2760_v3  ;;  %v2833_v3 = vld [vmem:[%s3751_s1 + $0x2e4] ss:$8 sps:$4 sm:$0xff]  }
  0x71   :  { %720 = vmatprep.subr.bf16.mxu0 %v2765_v4  ;;  %v2831_v4 = vld [vmem:[%s3751_s1 + $0x2e0] ss:$8 sps:$4 sm:$0xff]  }
  0x74   :  { %721 = vmatpush1.bf16.msra.mxu0 %v2763_v7  ;;  %v3441_v7 = vcombine.low %v3334_v37, %v3334_v37  ;;  %v2969_v37 = vld [vmem:[%s3756_s6 + $0x148] sm:$0xff]  }
  0x75   :  { %722 = vmatprep.subr.bf16.mxu0 %v2768_v8  ;;  %v2881_v8 = vld [vmem:[#allocation2 + $0x1c4] ss:$16 sps:$4 sm:$0xff]  }
  0x76   :  { %1224 = vmatprep.subr.bf16.mxu1 %v2881_v8  ;;  %v2922_v8 = vld [vmem:[#allocation2 + $0x16c] ss:$16 sps:$4 sm:$0xff]  }
  0x77   :  { %1225 = vmatpush1.bf16.msra.mxu1 %v2883_v9  ;;  %v2920_v9 = vld [vmem:[#allocation2 + $0x168] ss:$16 sps:$4 sm:$0xff]  }
  0x78   :  { %723 = vmatpush1.bf16.msra.mxu0 %v2766_v11  ;;  %v2886_v11 = vld [vmem:[#allocation2 + $0x1e0] ss:$16 sps:$4 sm:$0xff]   ;;  %1226 = vmatprep.subr.bf16.mxu1 %v2884_v10  ;;  %v2925_v10 = vld [vmem:[#allocation2 + $0x18c] ss:$16 sps:$4 sm:$0xff]  }
  0x79   :  { %724 = vmatprep.subr.bf16.mxu0 %v2771_v12  ;;  %v2889_v12 = vld [vmem:[#allocation2 + $0xc] ss:$16 sps:$4 sm:$0xff]  }
  0x7b   :  { %1227 = vmatpush1.bf16.msra.mxu1 %v2886_v11  ;;  %v2923_v11 = vld [vmem:[#allocation2 + $0x188] ss:$16 sps:$4 sm:$0xff]  }
  0x7c   :  { %725 = vmatpush1.bf16.msra.mxu0 %v2769_v16  ;;  %1237 = vmatprep.subr.bf16.mxu1 %v2889_v12  ;;  %v154_v16 = vsub.s32 0, %v3445_v15  ;;  %v2928_v12 = vld [vmem:[#allocation2 + $0x1ac] ss:$16 sps:$4 sm:$0xff]  }
  0x7d   :  { %726 = vmatprep.subr.bf16.mxu0 %v2774_v17  ;;  %v150_v17 = vld [vmem:[%s3752_s2] sm:$0x3] }
  0x7e   :  { %v155_v19 = vrot.slane %v150_v17, %v154_v16 }
  0x80   :  { %727 = vmatpush1.bf16.msra.mxu0 %v2772_v20  ;;  %v159_v20 = vrot.slane %v150_v17, %v158_v18  ;;  %v2929_v17 = vld [vmem:[#allocation2 + $0x1c8] ss:$16 sps:$4 sm:$0xff]  }
  0x81   :  { %728 = vmatprep.subr.bf16.mxu0 %v2777_v21 }
  0x84   :  { %729 = vmatpush1.bf16.msra.mxu0 %v2775_v24 }
  0x85   :  { %730 = vmatprep.subr.bf16.mxu0 %v2780_v25 }
  0x88   :  { %731 = vmatpush1.bf16.msra.mxu0 %v2778_v28 }
  0x89   :  { %732 = vmatprep.subr.bf16.mxu0 %v2783_v29 }
  0x8c   :  { %733 = vmatpush1.bf16.msra.mxu0 %v2781_v31  ;;  %v2967_v31 = vld [vmem:[%s3756_s6 + $0x140] sm:$0xff]  }
  0x8d   :  { %734 = vmatprep.subr.bf16.mxu0 %v2786_v32  ;;  %v2968_v32 = vld [vmem:[%s3756_s6 + $0x100] sm:$0xff]  }
  0x90   :  { %735 = vmatpush1.bf16.msra.mxu0 %v2784_v33 }
  0x91   :  { %745 = vmatprep.subr.bf16.mxu0 %v2791_v34  ;;  %v2892_v34 = vld [vmem:[#allocation2 + $0x2c] ss:$16 sps:$4 sm:$0xff]  }
  0x93   :  { %737 = vmatmul.mubr.bf16.vlgmr.msra.gmra.mrb[0].mxu0 %v3341_v40 }
  0x94   :  { %746 = vmatpush1.bf16.msra.mxu0 %v2789_v39  ;;  %777 = vmatprep.mubr.bf16.mxu0 %v3348_v42  ;;  %v2970_v39 = vld [vmem:[%s3756_s6 + $0x108] sm:$0xff]  }
  0x95   :  { %747 = vmatprep.subr.bf16.mxu0 %v2794_v41  ;;  %v2890_v41 = vld [vmem:[#allocation2 + $0x28] ss:$16 sps:$4 sm:$0xff]  }
  0x98   :  { %748 = vmatpush1.bf16.msra.mxu0 %v2792_v43  ;;  %v2895_v43 = vld [vmem:[#allocation2 + $0x4c] ss:$16 sps:$4 sm:$0xff]  }
  0x99   :  { %749 = vmatprep.subr.bf16.mxu0 %v2797_v35  ;;  %v2973_v35 = vld [vmem:[%s3756_s6 + $0x110] sm:$0xff]  }
  0x9c   :  { %750 = vmatpush1.bf16.msra.mxu0 %v2795_v44  ;;  %v2893_v44 = vld [vmem:[#allocation2 + $0x48] ss:$16 sps:$4 sm:$0xff]  }
  0x9d   :  { %751 = vmatprep.subr.bf16.mxu0 %v2800_v45  ;;  %v2898_v45 = vld [vmem:[#allocation2 + $0x6c] ss:$16 sps:$4 sm:$0xff]  }
  0xa0   :  { %752 = vmatpush1.bf16.msra.mxu0 %v2798_v46  ;;  %v2896_v46 = vld [vmem:[#allocation2 + $0x68] ss:$16 sps:$4 sm:$0xff]  }
  0xa1   :  { %753 = vmatprep.subr.bf16.mxu0 %v2803_v47  ;;  %v2977_v47 = vld [vmem:[%s3756_s6 + $0x158] sm:$0xff]  }
  0xa4   :  { %754 = vmatpush1.bf16.msra.mxu0 %v2801_v48  ;;  %v2978_v48 = vld [vmem:[%s3756_s6 + $0x118] sm:$0xff]  }
  0xa5   :  { %755 = vmatprep.subr.bf16.mxu0 %v2806_v49  ;;  %v2901_v49 = vld [vmem:[#allocation2 + $0x8c] ss:$16 sps:$4 sm:$0xff]  }
  0xa8   :  { %756 = vmatpush1.bf16.msra.mxu0 %v2804_v50  ;;  %v2899_v50 = vld [vmem:[#allocation2 + $0x88] ss:$16 sps:$4 sm:$0xff]  }
  0xa9   :  { %757 = vmatprep.subr.bf16.mxu0 %v2809_v51  ;;  %v2981_v51 = vld [vmem:[%s3756_s6 + $0x160] sm:$0xff]  }
  0xac   :  { %758 = vmatpush1.bf16.msra.mxu0 %v2807_v52  ;;  %v2982_v52 = vld [vmem:[%s3756_s6 + $0x120] sm:$0xff]  }
  0xad   :  { %759 = vmatprep.subr.bf16.mxu0 %v2812_v53  ;;  %v2904_v53 = vld [vmem:[#allocation2 + $0xac] ss:$16 sps:$4 sm:$0xff]  }
  0xb0   :  { %760 = vmatpush1.bf16.msra.mxu0 %v2810_v54  ;;  %v2902_v54 = vld [vmem:[#allocation2 + $0xa8] ss:$16 sps:$4 sm:$0xff]  }
  0xb1   :  { %761 = vmatprep.subr.bf16.mxu0 %v2815_v55  ;;  %v2985_v55 = vld [vmem:[%s3756_s6 + $0x168] sm:$0xff]  }
  0xb4   :  { %762 = vmatpush1.bf16.msra.mxu0 %v2813_v56  ;;  %v2986_v56 = vld [vmem:[%s3756_s6 + $0x128] sm:$0xff]  }
  0xb5   :  { %763 = vmatprep.subr.bf16.mxu0 %v2818_v57  ;;  %v2907_v57 = vld [vmem:[#allocation2 + $0xcc] ss:$16 sps:$4 sm:$0xff]  }
  0xb8   :  { %764 = vmatpush1.bf16.msra.mxu0 %v2816_v58  ;;  %v2905_v58 = vld [vmem:[#allocation2 + $0xc8] ss:$16 sps:$4 sm:$0xff]  }
  0xb9   :  { %765 = vmatprep.subr.bf16.mxu0 %v2821_v59  ;;  %v2989_v59 = vld [vmem:[%s3756_s6 + $0x170] sm:$0xff]  }
  0xbc   :  { %766 = vmatpush1.bf16.msra.mxu0 %v2819_v60  ;;  %v2990_v60 = vld [vmem:[%s3756_s6 + $0x130] sm:$0xff]  }
  0xbd   :  { %767 = vmatprep.subr.bf16.mxu0 %v2824_v61  ;;  %v2910_v61 = vld [vmem:[#allocation2 + $0xec] ss:$16 sps:$4 sm:$0xff]  }
  0xc0   :  { %768 = vmatpush1.bf16.msra.mxu0 %v2822_v62  ;;  %v2908_v62 = vld [vmem:[#allocation2 + $0xe8] ss:$16 sps:$4 sm:$0xff]  }
  0xc1   :  { %769 = vmatprep.subr.bf16.mxu0 %v2827_v63  ;;  %v2993_v63 = vld [vmem:[%s3756_s6 + $0x178] sm:$0xff]  }
  0xc4   :  { %770 = vmatpush1.bf16.msra.mxu0 %v2825_v0  ;;  %v2994_v0 = vld [vmem:[%s3756_s6 + $0x138] sm:$0xff]  }
  0xc5   :  { %771 = vmatprep.subr.bf16.mxu0 %v2830_v1  ;;  %v2913_v1 = vld [vmem:[#allocation2 + $0x10c] ss:$16 sps:$4 sm:$0xff]  }
  0xc8   :  { %772 = vmatpush1.bf16.msra.mxu0 %v2828_v2  ;;  %v2911_v2 = vld [vmem:[#allocation2 + $0x108] ss:$16 sps:$4 sm:$0xff]  }
  0xc9   :  { %773 = vmatprep.subr.bf16.mxu0 %v2833_v3  ;;  %v2916_v3 = vld [vmem:[#allocation2 + $0x12c] ss:$16 sps:$4 sm:$0xff]  }
  0xcc   :  { %774 = vmatpush1.bf16.msra.mxu0 %v2831_v4  ;;  %v2914_v4 = vld [vmem:[#allocation2 + $0x128] ss:$16 sps:$4 sm:$0xff]  }
  0xcd   :  { %775 = vmatprep.subr.bf16.mxu0 %v2836_v5  ;;  %v2919_v5 = vld [vmem:[#allocation2 + $0x14c] ss:$16 sps:$4 sm:$0xff]  }
  0xd0   :  { %776 = vmatpush1.bf16.msra.mxu0 %v2834_v6  ;;  %v2917_v6 = vld [vmem:[#allocation2 + $0x148] ss:$16 sps:$4 sm:$0xff]  }
  0xd1   :  { %2583 = vmatprep.subr.bf16.mxu0 %v2967_v31  ;;  %v2946_v31 = vld [vmem:[%s3756_s6 + $0x28] sm:$0xff]  }
  0xd3   :  { %778 = vmatmul.mubr.bf16.vlgmr.msra.gmra.mrb[0].mxu0 %v3441_v7 }
  0xd4   :  { %1864 = vmatprep.mubr.bf16.mxu0 %v3348_v42  ;;  %2584 = vmatpush3.bf16.msra.mxu0 %v2968_v32  ;;  %v2972_v42 = vld [vmem:[%s3756_s6 + $0x150] sm:$0xff]  }
  0xd5   :  { %2585 = vmatprep.subr.bf16.mxu0 %v2969_v37  ;;  %v2947_v32 = vld [vmem:[%s3756_s6 + $0x70] sm:$0xff]   ;;  %v2950_v37 = vld [vmem:[%s3756_s6 + $0x38] sm:$0xff]  }
  0xd8   :  { %2586 = vmatpush3.bf16.msra.mxu0 %v2970_v39  ;;  %v2951_v39 = vld [vmem:[%s3756_s6 + $0xc0] sm:$0xff]  }
  0xd9   :  { %2587 = vmatprep.subr.bf16.mxu0 %v2972_v42  ;;  %v3002_v42 = vld [vmem:[%s3755_s5 + $0x80] sm:$0xff]  }
  0xdc   :  { %2588 = vmatpush3.bf16.msra.mxu0 %v2973_v35  ;;  %v2952_v35 = vld [vmem:[%s3756_s6 + $0x80] sm:$0xff]  }
  0xdd   :  { %2589 = vmatprep.subr.bf16.mxu0 %v2977_v47  ;;  %v2954_v47 = vld [vmem:[%s3756_s6 + $0x88] sm:$0xff]  }
  0xe0   :  { %2590 = vmatpush3.bf16.msra.mxu0 %v2978_v48  ;;  %v2955_v48 = vld [vmem:[%s3756_s6 + $0xd0] sm:$0xff]  }
  0xe1   :  { %2591 = vmatprep.subr.bf16.mxu0 %v2981_v51  ;;  %v3008_v51 = vld [vmem:[%s3755_s5 + $0x98] sm:$0xff]  }
  0xe4   :  { %2592 = vmatpush3.bf16.msra.mxu0 %v2982_v52  ;;  %v3009_v52 = vld [vmem:[%s3755_s5 + $0xe0] sm:$0xff]  }
  0xe5   :  { %2593 = vmatprep.subr.bf16.mxu0 %v2985_v55  ;;  %v3010_v55 = vld [vmem:[%s3755_s5 + $0xa0] sm:$0xff]  }
  0xe8   :  { %2594 = vmatpush3.bf16.msra.mxu0 %v2986_v56  ;;  %v3011_v56 = vld [vmem:[%s3755_s5 + $0xe8] sm:$0xff]  }
  0xe9   :  { %2595 = vmatprep.subr.bf16.mxu0 %v2989_v59  ;;  %v3012_v59 = vld [vmem:[%s3755_s5 + $0xa8] sm:$0xff]  }
  0xec   :  { %2596 = vmatpush3.bf16.msra.mxu0 %v2990_v60  ;;  %v2962_v60 = vld [vmem:[%s3756_s6 + $0xa8] sm:$0xff]  }
  0xed   :  { %2597 = vmatprep.subr.bf16.mxu0 %v2993_v63  ;;  %v2965_v63 = vld [vmem:[%s3756_s6 + $0xf8] sm:$0xff]  }
  0xf0   :  { %2598 = vmatpush3.bf16.msra.mxu0 %v2994_v0  ;;  %v2966_v0 = vld [vmem:[%s3756_s6 + $0xb8] sm:$0xff]  }
  0xf3   :  { %1865 = vmatmul.mubr.bf16.vlgmr.msra.gmra.mrb[4].mxu0 %v3441_v7  ;;  %v2931_v7 = vld [vmem:[#allocation2 + $0x1cc] ss:$16 sps:$4 sm:$0xff]  }
 0x1a6   :  { %v779_v21 = vpop.f32.mrb[0].mxu0 }
 0x1a7   :  { %v2674_v22 = vadd.f32 %v779_v21, %v155_v19  ;;  %v781_v23 = vpop.f32.mrb[1].mxu0  ;;  %v2934_v19 = vld [vmem:[#allocation2 + $0x1ec] ss:$16 sps:$4 sm:$0xff]   ;;  %v2935_v21 = vld [vmem:[%s3756_s6 + $0x40] sm:$0xff]  }
 0x1a8   :  { %v2675_v24 = vadd.f32 %v781_v23, %v159_v20  ;;  %v783_v25 = vpop.f32.mrb[2].mxu0  ;;  %v2932_v20 = vld [vmem:[#allocation2 + $0x1e8] ss:$16 sps:$4 sm:$0xff]  }
 0x1a9   :  { %v786_v26 = vmax.f32 %v2674_v22, 0.0  ;;  %v784_v27 = vpop.f32.mrb[3].mxu0  ;;  %v2936_v22 = vld [vmem:[%s3756_s6] sm:$0xff]   ;;  %v2937_v23 = vld [vmem:[%s3756_s6 + $0x48] sm:$0xff]   ;;  %v2939_v25 = vld [vmem:[%s3756_s6 + $0x50] sm:$0xff]  }
 0x1aa   :  { %v787_v28 = vmax.f32 %v2675_v24, 0.0  ;;  %v2938_v24 = vld [vmem:[%s3756_s6 + $0x8] sm:$0xff]   ;;  %v2941_v27 = vld [vmem:[%s3756_s6 + $0x58] sm:$0xff]  }
 0x1ab   :  { %v3462_v33 = vpack.c.bf16 %v786_v26, %v786_v26  ;;  %v2940_v26 = vld [vmem:[%s3756_s6 + $0x10] sm:$0xff]  }
 0x1ac   :  { %v789_v29 = vpack.c.bf16 %v787_v28, %v787_v28  ;;  %v2943_v28 = vld [vmem:[%s3756_s6 + $0x60] sm:$0xff]  }
 0x1ae   :  { %1228 = vmatprep.mubr.bf16.mxu1 %v789_v29 }
 0x1af   :  { %1229 = vmatmul.mubr.bf16.vlgmr.msra.gmra.mrb[0].mxu1 %v3462_v33 }
 0x1b0   :  { %1238 = vmatpush1.bf16.msra.mxu1 %v2887_v30  ;;  %1269 = vmatprep.mubr.bf16.mxu1 %v789_v29  ;;  %v2944_v29 = vld [vmem:[%s3756_s6 + $0x20] sm:$0xff]   ;;  %v2945_v30 = vld [vmem:[%s3756_s6 + $0x68] sm:$0xff]  }
 0x1b1   :  { %1239 = vmatprep.subr.bf16.mxu1 %v2892_v34  ;;  %v2949_v34 = vld [vmem:[%s3756_s6 + $0x78] sm:$0xff]  }
 0x1b4   :  { %1240 = vmatpush1.bf16.msra.mxu1 %v2890_v41  ;;  %v3001_v41 = vld [vmem:[%s3755_s5 + $0xc0] sm:$0xff]  }
 0x1b5   :  { %1241 = vmatprep.subr.bf16.mxu1 %v2895_v43  ;;  %v3003_v43 = vld [vmem:[%s3755_s5 + $0xc8] sm:$0xff]   ;;  %2629 = vmatprep.subr.bf16.mxu0 %v3001_v41 }
 0x1b6   :  { %2630 = vmatpush3.bf16.msra.mxu0 %v3002_v42 }
 0x1b7   :  { %2631 = vmatprep.subr.bf16.mxu0 %v3003_v43 }
 0x1b8   :  { %1242 = vmatpush1.bf16.msra.mxu1 %v2893_v44  ;;  %v2953_v44 = vld [vmem:[%s3756_s6 + $0xc8] sm:$0xff]  }
 0x1b9   :  { %1243 = vmatprep.subr.bf16.mxu1 %v2898_v45  ;;  %v3004_v45 = vld [vmem:[%s3755_s5 + $0x88] sm:$0xff]  }
 0x1ba   :  { %2632 = vmatpush3.bf16.msra.mxu0 %v3004_v45 }
 0x1bc   :  { %1244 = vmatpush1.bf16.msra.mxu1 %v2896_v46  ;;  %v3005_v46 = vld [vmem:[%s3755_s5 + $0xd0] sm:$0xff]  }
 0x1bd   :  { %1245 = vmatprep.subr.bf16.mxu1 %v2901_v49  ;;  %2633 = vmatprep.subr.bf16.mxu0 %v3005_v46  ;;  %v3007_v49 = vld [vmem:[%s3755_s5 + $0xd8] sm:$0xff]   ;;  %v866_v46 = vsub.s32 2, %v3445_v15 }
 0x1c0   :  { %1246 = vmatpush1.bf16.msra.mxu1 %v2899_v50  ;;  %v2957_v50 = vld [vmem:[%s3756_s6 + $0xd8] sm:$0xff]  }
 0x1c1   :  { %1247 = vmatprep.subr.bf16.mxu1 %v2904_v53  ;;  %v2958_v53 = vld [vmem:[%s3756_s6 + $0x98] sm:$0xff]  }
 0x1c4   :  { %1248 = vmatpush1.bf16.msra.mxu1 %v2902_v54  ;;  %v2959_v54 = vld [vmem:[%s3756_s6 + $0xe0] sm:$0xff]  }
 0x1c5   :  { %1249 = vmatprep.subr.bf16.mxu1 %v2907_v57  ;;  %v2960_v57 = vld [vmem:[%s3756_s6 + $0xa0] sm:$0xff]  }
 0x1c8   :  { %1250 = vmatpush1.bf16.msra.mxu1 %v2905_v58  ;;  %v2961_v58 = vld [vmem:[%s3756_s6 + $0xe8] sm:$0xff]  }
 0x1c9   :  { %1251 = vmatprep.subr.bf16.mxu1 %v2910_v61  ;;  %v2963_v61 = vld [vmem:[%s3756_s6 + $0xf0] sm:$0xff]  }
 0x1cc   :  { %1252 = vmatpush1.bf16.msra.mxu1 %v2908_v62  ;;  %v2964_v62 = vld [vmem:[%s3756_s6 + $0xb0] sm:$0xff]  }
 0x1cd   :  { %1253 = vmatprep.subr.bf16.mxu1 %v2913_v1  ;;  %v2971_v1 = vld [vmem:[%s3756_s6 + $0x180] sm:$0x3f]  }
 0x1d0   :  { %1254 = vmatpush1.bf16.msra.mxu1 %v2911_v2  ;;  %v3048_v2 = vmov 0.0  }
 0x1d1   :  { %1255 = vmatprep.subr.bf16.mxu1 %v2916_v3  ;;  %v1750_v3 = vsel %vm1748_vm0, %v2971_v1, 0 }
 0x1d4   :  { %1256 = vmatpush1.bf16.msra.mxu1 %v2914_v4  ;;  %v2974_v4 = vld [vmem:[%s3755_s5 + $0x40] sm:$0xff]  }
 0x1d5   :  { %1257 = vmatprep.subr.bf16.mxu1 %v2919_v5  ;;  %v2975_v5 = vld [vmem:[%s3750_s0 + $0x18] ss:$0 sps:$4 sm:$0xff]  }
 0x1d8   :  { %1258 = vmatpush1.bf16.msra.mxu1 %v2917_v6  ;;  %v2976_v6 = vld [vmem:[%s3755_s5] sm:$0xff]  }
 0x1d9   :  { %1259 = vmatprep.subr.bf16.mxu1 %v2922_v8  ;;  %v2979_v8 = vld [vmem:[%s3755_s5 + $0x48] sm:$0xff]  }
 0x1dc   :  { %1260 = vmatpush1.bf16.msra.mxu1 %v2920_v9  ;;  %v2983_v9 = vld [vmem:[%s3755_s5 + $0x50] sm:$0xff]  }
 0x1dd   :  { %1261 = vmatprep.subr.bf16.mxu1 %v2925_v10  ;;  %v2984_v10 = vld [vmem:[%s3755_s5 + $0x10] sm:$0xff]  }
 0x1e0   :  { %1262 = vmatpush1.bf16.msra.mxu1 %v2923_v11  ;;  %v2987_v11 = vld [vmem:[%s3755_s5 + $0x58] sm:$0xff]  }
 0x1e1   :  { %1263 = vmatprep.subr.bf16.mxu1 %v2928_v12  ;;  %v2988_v12 = vld [vmem:[%s3755_s5 + $0x18] sm:$0xff]  }
 0x1e4   :  { %1264 = vmatpush1.bf16.msra.mxu1 %v2926_v13  ;;  %v2991_v13 = vld [vmem:[%s3755_s5 + $0x60] sm:$0xff]  }
 0x1e5   :  { %1265 = vmatprep.subr.bf16.mxu1 %v2931_v7  ;;  %v3013_v7 = vld [vmem:[%s3755_s5 + $0xf0] sm:$0xff]  }
 0x1e8   :  { %1266 = vmatpush1.bf16.msra.mxu1 %v2929_v17  ;;  %v3014_v17 = vld [vmem:[%s3755_s5 + $0xb0] sm:$0xff]  }
 0x1e9   :  { %1267 = vmatprep.subr.bf16.mxu1 %v2934_v19  ;;  %v2992_v19 = vld [vmem:[%s3755_s5 + $0x20] sm:$0xff]  }
 0x1ec   :  { %1268 = vmatpush1.bf16.msra.mxu1 %v2932_v20  ;;  %v2995_v20 = vld [vmem:[%s3755_s5 + $0x68] sm:$0xff]  }
 0x1ed   :  { %2539 = vmatprep.subr.bf16.mxu1 %v2935_v21  ;;  %v3015_v21 = vld [vmem:[%s3755_s5 + $0xf8] sm:$0xff]  }
 0x1ef   :  { %1270 = vmatmul.mubr.bf16.vlgmr.msra.gmra.mrb[4].mxu1 %v3462_v33  ;;  %v2948_v33 = vld [vmem:[%s3756_s6 + $0x30] sm:$0xff]  }
 0x1f0   :  { %2540 = vmatpush3.bf16.msra.mxu1 %v2936_v22  ;;  %1784 = vmatprep.mubr.bf16.mxu1 %v3159_v14  ;;  %v2942_v14 = vld [vmem:[%s3756_s6 + $0x18] sm:$0xff]  }
 0x1f1   :  { %2541 = vmatprep.subr.bf16.mxu1 %v2937_v23  ;;  %v3016_v22 = vld [vmem:[%s3755_s5 + $0xb8] sm:$0xff]   ;;  %v2996_v23 = vld [vmem:[%s3755_s5 + $0x28] sm:$0xff]  }
 0x1f4   :  { %2542 = vmatpush3.bf16.msra.mxu1 %v2938_v24  ;;  %v2997_v24 = vld [vmem:[%s3755_s5 + $0x70] sm:$0xff]  }
 0x1f5   :  { %2543 = vmatprep.subr.bf16.mxu1 %v2939_v25  ;;  %v2998_v25 = vld [vmem:[%s3755_s5 + $0x30] sm:$0xff]  }
 0x1f8   :  { %2544 = vmatpush3.bf16.msra.mxu1 %v2940_v26  ;;  %v2999_v26 = vld [vmem:[%s3755_s5 + $0x78] sm:$0xff]  }
 0x1f9   :  { %2545 = vmatprep.subr.bf16.mxu1 %v2941_v27  ;;  %v3000_v27 = vld [vmem:[%s3755_s5 + $0x38] sm:$0xff]  }
 0x1fc   :  { %2546 = vmatpush3.bf16.msra.mxu1 %v2942_v14  ;;  %v854_v14 = vld [vmem:[%s3754_s4] sm:$0xf] }
 0x1fd   :  { %2547 = vmatprep.subr.bf16.mxu1 %v2943_v28  ;;  %v859_v28 = vrot.slane %v854_v14, %v154_v16 }
 0x200   :  { %2548 = vmatpush3.bf16.msra.mxu1 %v2944_v29  ;;  %v863_v29 = vrot.slane %v854_v14, %v158_v18 }
 0x201   :  { %2549 = vmatprep.subr.bf16.mxu1 %v2945_v30 }
 0x204   :  { %2550 = vmatpush3.bf16.msra.mxu1 %v2946_v31 }
 0x205   :  { %2551 = vmatprep.subr.bf16.mxu1 %v2947_v32 }
 0x208   :  { %2552 = vmatpush3.bf16.msra.mxu1 %v2948_v33 }
 0x209   :  { %2553 = vmatprep.subr.bf16.mxu1 %v2949_v34 }
 0x20c   :  { %2554 = vmatpush3.bf16.msra.mxu1 %v2950_v37 }
 0x20d   :  { %2561 = vmatprep.subr.bf16.mxu1 %v2951_v39 }
 0x20f   :  { %1785 = vmatmul.mubr.bf16.vlgmr.msra.gmra.mrb[8].mxu1 %v3227_v36  ;;  %v3006_v36 = vld [vmem:[%s3755_s5 + $0x90] sm:$0xff]  }
 0x210   :  { %2562 = vmatpush3.bf16.msra.mxu1 %v2952_v35  ;;  %1824 = vmatprep.mubr.bf16.mxu1 %v3234_v38  ;;  %v2956_v38 = vld [vmem:[%s3756_s6 + $0x90] sm:$0xff]   ;;  %v2599_v35 = vpop.f32.mrb[4].mxu0 }
 0x211   :  { %2563 = vmatprep.subr.bf16.mxu1 %v2953_v44  ;;  %2634 = vmatpush3.bf16.msra.mxu0 %v3006_v36  ;;  %v2600_v16 = vpop.f32.mrb[5].mxu0 }
 0x212   :  { %2635 = vmatprep.subr.bf16.mxu0 %v3007_v49  ;;  %v2601_v44 = vadd.f32 %v2600_v16, %v2599_v35  ;;  %v2602_v45 = vpop.f32.mrb[6].mxu0 }
 0x213   :  { %v2603_v18 = vpop.f32.mrb[7].mxu0 }
 0x214   :  { %2564 = vmatpush3.bf16.msra.mxu1 %v2954_v47  ;;  %v870_v47 = vsub.s32 3, %v3445_v15 }
 0x215   :  { %2565 = vmatprep.subr.bf16.mxu1 %v2955_v48  ;;  %2636 = vmatpush3.bf16.msra.mxu0 %v3008_v51  ;;  %v867_v48 = vrot.slane %v854_v14, %v866_v46 }
 0x216   :  { %2637 = vmatprep.subr.bf16.mxu0 %v3009_v52  ;;  %v871_v36 = vrot.slane %v854_v14, %v870_v47  ;;  %v2532_v14 = vld [vmem:[%s3757_s7] ss:$0 sm:$0xff] }
 0x218   :  { %2566 = vmatpush3.bf16.msra.mxu1 %v2956_v38 }
 0x219   :  { %2567 = vmatprep.subr.bf16.mxu1 %v2957_v50  ;;  %2638 = vmatpush3.bf16.msra.mxu0 %v3010_v55 }
 0x21a   :  { %2639 = vmatprep.subr.bf16.mxu0 %v3011_v56 }
 0x21c   :  { %2568 = vmatpush3.bf16.msra.mxu1 %v2958_v53 }
 0x21d   :  { %2569 = vmatprep.subr.bf16.mxu1 %v2959_v54  ;;  %2640 = vmatpush3.bf16.msra.mxu0 %v3012_v59  ;;  %v3017_v59 = vld [vmem:[%s3758_s8] sm:$0xff]  }
 0x21e   :  { %2641 = vmatprep.subr.bf16.mxu0 %v3013_v7  ;;  %v3020_v7 = vld [vmem:[%s3758_s8 + $0x18] sm:$0xff]  }
 0x220   :  { %2570 = vmatpush3.bf16.msra.mxu1 %v2960_v57 }
 0x221   :  { %2571 = vmatprep.subr.bf16.mxu1 %v2961_v58  ;;  %2642 = vmatpush3.bf16.msra.mxu0 %v3014_v17 }
 0x222   :  { %2643 = vmatprep.subr.bf16.mxu0 %v3015_v21 }
 0x224   :  { %2572 = vmatpush3.bf16.msra.mxu1 %v2962_v60 }
 0x225   :  { %2573 = vmatprep.subr.bf16.mxu1 %v2963_v61  ;;  %2644 = vmatpush3.bf16.msra.mxu0 %v3016_v22 }
 0x228   :  { %2574 = vmatpush3.bf16.msra.mxu1 %v2964_v62 }
 0x229   :  { %2575 = vmatprep.subr.bf16.mxu1 %v2965_v63 }
 0x22c   :  { %2576 = vmatpush3.bf16.msra.mxu1 %v2966_v0 }
 0x22d   :  { %2656 = vmatprep.subr.bf16.mxu1 %v3048_v2 }
 0x22f   :  { %1825 = vmatmul.mubr.bf16.vlgmr.msra.gmra.mrb[12].mxu1 %v3341_v40  ;;  %v2980_v40 = vld [vmem:[%s3755_s5 + $0x8] sm:$0xff]  }
 0x230   :  { %2657 = vmatpush3.bf16.msra.mxu1 %v1750_v3  ;;  %2658 = vmatprep.mubr.msk.bf16.mxu1 %vm3049_vm1, %v3048_v2 }
 0x231   :  { %2607 = vmatprep.subr.bf16.mxu1 %v2974_v4 }
 0x237   :  { %2659 = vmatmul.mubr.msk.bf16.vlgmr.msra.gmra.mrb[16].mxu1 %vm1744_vm2, %v2975_v5 }
 0x238   :  { %2608 = vmatpush3.bf16.msra.mxu1 %v2976_v6 }
 0x239   :  { %2609 = vmatprep.subr.bf16.mxu1 %v2979_v8 }
 0x23c   :  { %2610 = vmatpush3.bf16.msra.mxu1 %v2980_v40 }
 0x23d   :  { %2611 = vmatprep.subr.bf16.mxu1 %v2983_v9 }
 0x240   :  { %2612 = vmatpush3.bf16.msra.mxu1 %v2984_v10 }
 0x241   :  { %2613 = vmatprep.subr.bf16.mxu1 %v2987_v11 }
 0x244   :  { %2614 = vmatpush3.bf16.msra.mxu1 %v2988_v12  ;;  %v3018_v12 = vld [vmem:[%s3758_s8 + $0x8] sm:$0xff]  }
 0x245   :  { %2615 = vmatprep.subr.bf16.mxu1 %v2991_v13  ;;  %v3019_v13 = vld [vmem:[%s3758_s8 + $0x10] sm:$0xff]  }
 0x248   :  { %2616 = vmatpush3.bf16.msra.mxu1 %v2992_v19 }
 0x249   :  { %2617 = vmatprep.subr.bf16.mxu1 %v2995_v20 }
 0x24c   :  { %2618 = vmatpush3.bf16.msra.mxu1 %v2996_v23 }
 0x24d   :  { %2619 = vmatprep.subr.bf16.mxu1 %v2997_v24 }
 0x250   :  { %2620 = vmatpush3.bf16.msra.mxu1 %v2998_v25 }
 0x251   :  { %2621 = vmatprep.subr.bf16.mxu1 %v2999_v26 }
 0x254   :  { %2622 = vmatpush3.bf16.msra.mxu1 %v3000_v27 }
 0x255   :  { %2662 = vmatprep.subr.bf16.mxu1 %v3048_v2 }
 0x282   :  { %v1230_v30 = vpop.f32.mrb[0].mxu1 }
 0x283   :  { %v1231_v31 = vadd.f32 %v1230_v30, %v859_v28  ;;  %v1232_v32 = vpop.f32.mrb[1].mxu1 }
 0x284   :  { %v1233_v33 = vadd.f32 %v1232_v32, %v863_v29  ;;  %v1234_v34 = vpop.f32.mrb[2].mxu1  ;;  %v2533_v32 = vld [vmem:[%s3759_s9] ss:$0 sm:$0xff] }
 0x285   :  { %v1278_v37 = vmax.f32 %v1231_v31, 0.0  ;;  %v1235_v39 = vpop.f32.mrb[3].mxu1 }
 0x286   :  { %v1279_v41 = vmax.f32 %v1233_v33, 0.0 }
 0x287   :  { %v1282_v43 = vpack.c.bf16 %v1278_v37, %v1278_v37 }
 0x288   :  { %v1283_v42 = vpack.c.bf16 %v1279_v41, %v1279_v41 }
 0x28a   :  { %2136 = vmatprep.mubr.bf16.mxu1 %v1283_v42 }
 0x28b   :  { %2137 = vmatmul.mubr.bf16.vlgmr.msra.gmra.mrb[20].mxu1 %v1282_v43 }
 0x28c   :  { %2670 = vmatprep.mubr.msk.bf16.mxu1 %vm3049_vm1, %v3048_v2  ;;  %2663 = vmatpush3.bf16.msra.mxu1 %v3017_v59 }
 0x28d   :  { %2664 = vmatprep.subr.bf16.mxu1 %v3048_v2 }
 0x290   :  { %2665 = vmatpush3.bf16.msra.mxu1 %v3018_v12 }
 0x291   :  { %2666 = vmatprep.subr.bf16.mxu1 %v3048_v2 }
 0x294   :  { %2667 = vmatpush3.bf16.msra.mxu1 %v3019_v13 }
 0x295   :  { %2668 = vmatprep.subr.bf16.mxu1 %v3048_v2 }
 0x298   :  { %2669 = vmatpush3.bf16.msra.mxu1 %v3020_v7 }
 0x2c2   :  { %v1271_v49 = vpop.f32.mrb[4].mxu1 }
 0x2c3   :  { %v1272_v38 = vadd.f32 %v1271_v49, %v867_v48  ;;  %v1273_v50 = vpop.f32.mrb[5].mxu1 }
 0x2c4   :  { %v1274_v51 = vadd.f32 %v1273_v50, %v871_v36  ;;  %v1275_v52 = vpop.f32.mrb[6].mxu1 }
 0x2c5   :  { %v1280_v53 = vmax.f32 %v1272_v38, 0.0  ;;  %v1276_v54 = vpop.f32.mrb[7].mxu1 }
 0x2c6   :  { %v1281_v55 = vmax.f32 %v1274_v51, 0.0 }
 0x2c7   :  { %v1284_v57 = vpack.c.bf16 %v1280_v53, %v1280_v53 }
 0x2c8   :  { %v1285_v56 = vpack.c.bf16 %v1281_v55, %v1281_v55 }
 0x2ca   :  { %2176 = vmatprep.mubr.bf16.mxu0 %v1285_v56 }
 0x2cb   :  { %2177 = vmatmul.mubr.bf16.vlgmr.msra.gmra.mrb[8].mxu0 %v1284_v57 }
 0x2e2   :  { %v2555_v58 = vpop.f32.mrb[8].mxu1 }
 0x2e3   :  { %v2556_v15 = vpop.f32.mrb[9].mxu1 }
 0x2e4   :  { %v2557_v60 = vadd.f32 %v2556_v15, %v2555_v58  ;;  %v2558_v61 = vpop.f32.mrb[10].mxu1 }
 0x2e5   :  { %v2559_v62 = vpop.f32.mrb[11].mxu1 }
 0x302   :  { %v2577_v63 = vpop.f32.mrb[12].mxu1 }
 0x303   :  { %v2578_v0 = vpop.f32.mrb[13].mxu1 }
 0x304   :  { %v2579_v1 = vadd.f32 %v2578_v0, %v2577_v63  ;;  %v2580_v3 = vpop.f32.mrb[14].mxu1 }
 0x305   :  { %v2581_v4 = vpop.f32.mrb[15].mxu1 }
 0x306   :  { %v1827_v5 = vadd.f32 %v2579_v1, %v2557_v60 }
 0x308   :  { %v1867_v6 = vadd.f32 %v2601_v44, %v1827_v5 }
 0x30a   :  { %v1906_v8 = vpop.f32.mrb[16].mxu1 }
 0x30b   :  { %v1907_v40 = vadd.f32 %v1906_v8, %v1867_v6  ;;  %v2660_v9 = vpop.f32.mrb[17].mxu1 }
 0x30c   :  { %v1909_v10 = vpop.f32.mrb[18].mxu1 }
 0x30d   :  { %v2661_v11 = vpop.f32.mrb[19].mxu1 }
 0x35e   :  { %v2623_v17 = vpop.f32.mrb[20].mxu1 }
 0x35f   :  { %v2624_v19 = vpop.f32.mrb[21].mxu1 }
 0x360   :  { %v2625_v20 = vadd.f32 %v2624_v19, %v2623_v17  ;;  %v2626_v21 = vpop.f32.mrb[22].mxu1 }
 0x361   :  { %v2627_v22 = vpop.f32.mrb[23].mxu1 }
 0x362   :  { %v2139_v23 = vadd.f32 %v2625_v20, %v1907_v40 }
 0x39e   :  { %v2645_v24 = vpop.f32.mrb[8].mxu0 }
 0x39f   :  { %v2646_v25 = vpop.f32.mrb[9].mxu0 }
 0x3a0   :  { %v2647_v26 = vadd.f32 %v2646_v25, %v2645_v24  ;;  %v2648_v27 = vpop.f32.mrb[10].mxu0 }
 0x3a1   :  { %v2649_v2 = vpop.f32.mrb[11].mxu0 }
 0x3a2   :  { %v2179_v28 = vadd.f32 %v2647_v26, %v2139_v23 }
 0x3a4   :  { %v2191_v29 = vadd.f32 %v2532_v14, %v2179_v28 }
 0x3a6   :  { %v2192_v30 = vmax.f32 %v2191_v29, 0.0 }
 0x3a8   :  { %v2193_v31 = vpack.c.bf16 %v2192_v30, %v2192_v30 }
 0x3aa   :  { %2671 = vmatmul.mubr.msk.bf16.vlgmr.msra.gmra.mrb[24].mxu1 %vm2233_vm3, %v2193_v31 }
 0x47d   :  { %v2271_v33 = vpop.f32.mrb[24].mxu1 }
 0x47e   :  { %v2272_v34 = vadd.f32 %v2533_v32, %v2271_v33  ;;  %v2672_v37 = vpop.f32.mrb[25].mxu1 }
 0x47f   :  { %v2274_v39 = vpop.f32.mrb[26].mxu1 }
 0x480   :  { %2277 = vst [vmem:[%s3760_s10] sm:$0xff] %v2272_v34  ;;  %v2673_v41 = vpop.f32.mrb[27].mxu1 }
 0x481   :  { %2282 = vsyncpa [#allocation3], 1 }

</bundles_post_ra>
